<compile_context>
chip_gen: v6e
topology: v6e:2x2x1
jax: 0.10.0
libtpu: 0.0.40
codegen_flags: <defaults>
</compile_context>

<pallas_src>
import functools

import jax
import jax.numpy as jnp
from jax.experimental import pallas as pl
from jax.experimental.pallas import tpu as pltpu

HIDDEN = 128
LANE = 128
SUBLANE = 8


def _round_up(x, m):
    return ((x + m - 1) // m) * m


def _mlp_kernel(x_ref, w1_ref, b1_ref, w2_ref, b2_ref, o_ref):
    # hidden = ReLU(x @ W1 + b1): bf16 MXU matmul, f32 accumulate / elementwise.
    h = jnp.dot(x_ref[...], w1_ref[...], preferred_element_type=jnp.float32)
    h = jnp.maximum(h + b1_ref[...], 0.0)
    # out = hidden @ W2 + b2: cast hidden to bf16 for the MXU, accumulate f32.
    out = jnp.dot(h.astype(w2_ref.dtype), w2_ref[...],
                  preferred_element_type=jnp.float32)
    o_ref[...] = (out + b2_ref[...]).astype(o_ref.dtype)


def prepare_params(w1, b1, w2, b2):
    """One-time padding + bf16 cast of the weights.

    w1: (in_features, 128), b1: (128,), w2: (128, n_actions), b2: (n_actions,).
    Returns params with K padded to a multiple of 128 and N padded to 128,
    weights in bf16, biases in f32 (1, dim) layout.
    """
    in_features, hidden = w1.shape
    n_actions = w2.shape[1]
    k_pad = _round_up(in_features, LANE)
    n_pad = _round_up(n_actions, LANE)

    w1_p = jnp.pad(w1, ((0, k_pad - in_features), (0, 0))).astype(jnp.bfloat16)
    w2_p = jnp.pad(w2, ((0, 0), (0, n_pad - n_actions))).astype(jnp.bfloat16)
    b1_p = b1.reshape(1, hidden).astype(jnp.float32)
    b2_p = jnp.pad(b2, (0, n_pad - n_actions)).reshape(1, n_pad).astype(jnp.float32)
    return dict(w1=w1_p, b1=b1_p, w2=w2_p, b2=b2_p,
                in_features=in_features, n_actions=n_actions)


@functools.partial(jax.jit, static_argnames=("in_features", "n_actions"))
def _forward_impl(x_nchw, w1, b1, w2, b2, *, in_features, n_actions):
    B = x_nchw.shape[0]
    k_pad = w1.shape[0]
    hidden = w1.shape[1]
    n_pad = w2.shape[1]

    # nn.Flatten(): row-major flatten of (C, H, W); pad K with zero columns and
    # cast to bf16 for the MXU.
    x_flat = x_nchw.reshape(B, in_features)
    x_flat = jnp.pad(x_flat, ((0, 0), (0, k_pad - in_features)))
    x_flat = x_flat.astype(jnp.bfloat16)

    # Batch tiling: rows padded to a multiple of TILE_B (>= one sublane group).
    tile_b = min(256, _round_up(B, SUBLANE))
    b_pad = _round_up(B, tile_b)
    x_flat = jnp.pad(x_flat, ((0, b_pad - B), (0, 0)))
    grid = (b_pad // tile_b,)

    flops = 2 * b_pad * (k_pad * hidden + hidden * n_pad)
    bytes_accessed = (x_flat.size * 2 + w1.size * 2 + w2.size * 2
                      + b1.size * 4 + b2.size * 4 + b_pad * n_pad * 4)

    out = pl.pallas_call(
        _mlp_kernel,
        out_shape=jax.ShapeDtypeStruct((b_pad, n_pad), jnp.float32),
        grid_spec=pltpu.PrefetchScalarGridSpec(
            num_scalar_prefetch=0,
            grid=grid,
            in_specs=[
                # Activations stream over the batch grid.
                pl.BlockSpec((tile_b, k_pad), lambda i: (i, 0)),
                # Weights / biases: same block for every step -> stay in VMEM.
                pl.BlockSpec((k_pad, hidden), lambda i: (0, 0)),
                pl.BlockSpec((1, hidden), lambda i: (0, 0)),
                pl.BlockSpec((hidden, n_pad), lambda i: (0, 0)),
                pl.BlockSpec((1, n_pad), lambda i: (0, 0)),
            ],
            out_specs=pl.BlockSpec((tile_b, n_pad), lambda i: (i, 0)),
        ),
        compiler_params=pltpu.CompilerParams(
            dimension_semantics=("parallel",)),
        cost_estimate=pl.CostEstimate(
            flops=flops, transcendentals=0, bytes_accessed=bytes_accessed),
    )(x_flat, w1, b1, w2, b2)

    # Slice padded batch rows and padded action columns back off.
    return out[:B, :n_actions]


def basic_nn_forward(x_nchw, params, y=None):
    """x_nchw: (B, 3, H, W); `y` is ignored (matches basic_NN.forward)."""
    del y
    return _forward_impl(
        x_nchw, params["w1"], params["b1"], params["w2"], params["b2"],
        in_features=params["in_features"], n_actions=params["n_actions"])


def init_params(key, in_features, hidden, n_actions):
    """PyTorch nn.Linear default init (uniform +-1/sqrt(fan_in)), f32."""
    k1, k2, k3, k4 = jax.random.split(key, 4)
    lim1 = 1.0 / jnp.sqrt(jnp.float32(in_features))
    lim2 = 1.0 / jnp.sqrt(jnp.float32(hidden))
    # Stored as (in, out) = transpose of PyTorch's (out, in) layout.
    w1 = jax.random.uniform(k1, (in_features, hidden), jnp.float32, -lim1, lim1)
    b1 = jax.random.uniform(k2, (hidden,), jnp.float32, -lim1, lim1)
    w2 = jax.random.uniform(k3, (hidden, n_actions), jnp.float32, -lim2, lim2)
    b2 = jax.random.uniform(k4, (n_actions,), jnp.float32, -lim2, lim2)
    return w1, b1, w2, b2


if __name__ == "__main__":
    key = jax.random.PRNGKey(0)
    kx, ky, kp = jax.random.split(key, 3)

    # state_shape = (3, 8, 8), n_actions = 5, batch = 4
    B, C, H, W = 4, 3, 8, 8
    n_actions = 5
    in_features = C * H * W

    x = jax.random.normal(kx, (B, C, H, W), jnp.float32)
    y = jax.random.normal(ky, (B,), jnp.float32)  # ignored, as in PyTorch
    w1, b1, w2, b2 = init_params(kp, in_features, HIDDEN, n_actions)
    params = prepare_params(w1, b1, w2, b2)

    out = basic_nn_forward(x, params, y)
    out = jax.block_until_ready(out)

    # Full-f32 reference; kernel uses bf16 MXU inputs so allow bf16-level error.
    ref = jnp.maximum(x.reshape(B, -1) @ w1 + b1, 0.0) @ w2 + b2
    assert out.shape == (B, n_actions), out.shape
    assert jnp.allclose(out, ref, atol=3e-2, rtol=3e-2), (
        float(jnp.max(jnp.abs(out - ref))))

    print("KERNEL_OK")
</pallas_src>

<mosaic_0001>
module attributes {stable_mosaic.version = 11 : i64} {
  func.func @_mlp_kernel(%arg0: i32, %arg1: memref<8x256xbf16, #tpu.memory_space<vmem>>, %arg2: memref<256x128xbf16, #tpu.memory_space<vmem>>, %arg3: memref<1x128xf32, #tpu.memory_space<vmem>>, %arg4: memref<128x128xbf16, #tpu.memory_space<vmem>>, %arg5: memref<1x128xf32, #tpu.memory_space<vmem>>, %arg6: memref<8x128xf32, #tpu.memory_space<vmem>>) attributes {dimension_semantics = [#tpu.dimension_semantics<parallel>], iteration_bounds = array<i64: 1>, scalar_prefetch = 0 : i64, scratch_operands = 0 : i64, tpu.core_type = #tpu.core_type<tc>, window_params = [{transform_indices = @transform_0, window_bounds = array<i64: 8, 256>}, {pipeline_mode = #tpu.pipeline_mode<synchronous>, transform_indices = @transform_1, window_bounds = array<i64: 256, 128>}, {pipeline_mode = #tpu.pipeline_mode<synchronous>, transform_indices = @transform_2, window_bounds = array<i64: 1, 128>}, {pipeline_mode = #tpu.pipeline_mode<synchronous>, transform_indices = @transform_3, window_bounds = array<i64: 128, 128>}, {pipeline_mode = #tpu.pipeline_mode<synchronous>, transform_indices = @transform_4, window_bounds = array<i64: 1, 128>}, {transform_indices = @transform_5, window_bounds = array<i64: 8, 128>}]} {
    %c0 = arith.constant 0 : index
    %c0_0 = arith.constant 0 : index
    %0 = vector.load %arg1[%c0, %c0_0] : memref<8x256xbf16, #tpu.memory_space<vmem>>, vector<8x256xbf16>
    %c0_1 = arith.constant 0 : index
    %c0_2 = arith.constant 0 : index
    %1 = vector.load %arg2[%c0_1, %c0_2] : memref<256x128xbf16, #tpu.memory_space<vmem>>, vector<256x128xbf16>
    %cst = arith.constant dense<0.000000e+00> : vector<8x128xf32>
    %2 = tpu.matmul %0, %1, %cst {dimension_numbers = #tpu.dot_dimension_numbers<[1], [0], [0], [1], [0, 0, 1, 1], [], []>} : vector<8x256xbf16>, vector<256x128xbf16>, vector<8x128xf32> -> vector<8x128xf32>
    %c0_3 = arith.constant 0 : index
    %c0_4 = arith.constant 0 : index
    %3 = vector.load %arg3[%c0_3, %c0_4] : memref<1x128xf32, #tpu.memory_space<vmem>>, vector<1x128xf32>
    %4 = vector.broadcast %3 : vector<1x128xf32> to vector<8x128xf32>
    %5 = arith.addf %2, %4 : vector<8x128xf32>
    %cst_5 = arith.constant 0.000000e+00 : f32
    %6 = vector.broadcast %cst_5 : f32 to vector<8x128xf32>
    %7 = arith.maximumf %5, %6 : vector<8x128xf32>
    %8 = arith.truncf %7 : vector<8x128xf32> to vector<8x128xbf16>
    %c0_6 = arith.constant 0 : index
    %c0_7 = arith.constant 0 : index
    %9 = vector.load %arg4[%c0_6, %c0_7] : memref<128x128xbf16, #tpu.memory_space<vmem>>, vector<128x128xbf16>
    %cst_8 = arith.constant dense<0.000000e+00> : vector<8x128xf32>
    %10 = tpu.matmul %8, %9, %cst_8 {dimension_numbers = #tpu.dot_dimension_numbers<[1], [0], [0], [1], [0, 0, 1, 1], [], []>} : vector<8x128xbf16>, vector<128x128xbf16>, vector<8x128xf32> -> vector<8x128xf32>
    %c0_9 = arith.constant 0 : index
    %c0_10 = arith.constant 0 : index
    %11 = vector.load %arg5[%c0_9, %c0_10] : memref<1x128xf32, #tpu.memory_space<vmem>>, vector<1x128xf32>
    %12 = vector.broadcast %11 : vector<1x128xf32> to vector<8x128xf32>
    %13 = arith.addf %10, %12 : vector<8x128xf32>
    %c0_11 = arith.constant 0 : index
    %c0_12 = arith.constant 0 : index
    %14 = vector.load %arg6[%c0_11, %c0_12] : memref<8x128xf32, #tpu.memory_space<vmem>>, vector<8x128xf32>
    tpu.vector_store %arg6[%c0_11, %c0_12], %13 {strides = array<i32>} : memref<8x128xf32, #tpu.memory_space<vmem>>, vector<8x128xf32>,
    return
  }
  func.func @transform_0(%arg0: i32) -> (i32, i32) {
    %c0_i32 = arith.constant 0 : i32
    %c0_i32_0 = arith.constant 0 : i32
    return %arg0, %c0_i32 : i32, i32
  }
  func.func @transform_1(%arg0: i32) -> (i32, i32) {
    %c0_i32 = arith.constant 0 : i32
    %c0_i32_0 = arith.constant 0 : i32
    %c0_i32_1 = arith.constant 0 : i32
    return %c0_i32, %c0_i32_0 : i32, i32
  }
  func.func @transform_2(%arg0: i32) -> (i32, i32) {
    %c0_i32 = arith.constant 0 : i32
    %c0_i32_0 = arith.constant 0 : i32
    %c0_i32_1 = arith.constant 0 : i32
    return %c0_i32, %c0_i32_0 : i32, i32
  }
  func.func @transform_3(%arg0: i32) -> (i32, i32) {
    %c0_i32 = arith.constant 0 : i32
    %c0_i32_0 = arith.constant 0 : i32
    %c0_i32_1 = arith.constant 0 : i32
    return %c0_i32, %c0_i32_0 : i32, i32
  }
  func.func @transform_4(%arg0: i32) -> (i32, i32) {
    %c0_i32 = arith.constant 0 : i32
    %c0_i32_0 = arith.constant 0 : i32
    %c0_i32_1 = arith.constant 0 : i32
    return %c0_i32, %c0_i32_0 : i32, i32
  }
  func.func @transform_5(%arg0: i32) -> (i32, i32) {
    %c0_i32 = arith.constant 0 : i32
    %c0_i32_0 = arith.constant 0 : i32
    return %arg0, %c0_i32 : i32, i32
  }
}

</mosaic_0001>

<bundles_post_ra>
// kernel: _forward_impl.1
= control target key start
LH: loop header
LB: loop body
LE: loop exit
PB: predicated region body
PF: predicated region fallthrough
CT: control target
= control target key end

     0   :  { %v429_v1 = vmov 0.0   ;;  %vm430_vm0 = vmmov 0   ;;  %s554_s1 = inlined_call_operand.vmem [shape: bf16[256,128], index: 1, kind: input, shape index: {}]   ;;  %s555_s0 = inlined_call_operand.vmem [shape: bf16[8,256], index: 0, kind: input, shape index: {}]   ;;  %s556_s3 = inlined_call_operand.vmem [shape: bf16[128,128], index: 3, kind: input, shape index: {}]   ;;  %s557_s2 = inlined_call_operand.vmem [shape: f32[1,128], index: 2, kind: input, shape index: {}]   ;;  %s558_s4 = inlined_call_operand.vmem [shape: f32[1,128], index: 4, kind: input, shape index: {}]   ;;  %s559_s5 = inlined_call_operand.vmem [shape: f32[8,128], index: 5, kind: output, shape index: {}]  }
   0x1   :  { %v403_v0 = vld [vmem:[%s554_s1 + $0x78] sm:$0xff]   ;;  %381 = vmatprep.subr.bf16.mxu1 %v429_v1  ;;  %v405_v3 = vld [vmem:[%s554_s1 + $0x70] sm:$0xff]   ;;  %v407_v5 = vld [vmem:[%s554_s1 + $0x68] sm:$0xff]   ;;  %397 = vmatprep.mubr.msk.bf16.mxu1 %vm430_vm0, %v429_v1 }
   0x2   :  { %v404_v2 = vld [vmem:[%s554_s1 + $0x38] sm:$0xff]   ;;  %350 = vmatprep.subr.bf16.mxu0 %v403_v0  ;;  %v406_v4 = vld [vmem:[%s554_s1 + $0x30] sm:$0xff]   ;;  %v408_v6 = vld [vmem:[%s554_s1 + $0x28] sm:$0xff]  }
   0x3   :  { %351 = vmatpush3.bf16.msra.mxu0 %v404_v2  ;;  %v409_v7 = vld [vmem:[%s554_s1 + $0x60] sm:$0xff]   ;;  %v411_v9 = vld [vmem:[%s554_s1 + $0x58] sm:$0xff]   ;;  %v413_v11 = vld [vmem:[%s554_s1 + $0x50] sm:$0xff]  }
   0x4   :  { %352 = vmatprep.subr.bf16.mxu0 %v405_v3  ;;  %v410_v8 = vld [vmem:[%s554_s1 + $0x20] sm:$0xff]   ;;  %v412_v10 = vld [vmem:[%s554_s1 + $0x18] sm:$0xff]   ;;  %v414_v15 = vld [vmem:[%s554_s1 + $0x10] sm:$0xff]  }
   0x5   :  { %v21_v12 = vld [vmem:[%s555_s0] sm:$0xff]  ;;  %v421_v14 = vld [vmem:[%s556_s3 + $0x38] sm:$0xff]   ;;  %v415_v16 = vld [vmem:[%s554_s1 + $0x48] sm:$0xff]  }
   0x6   :  { %v324_v13 = vcombine.high %v21_v12, %v21_v12  ;;  %382 = vmatpush3.bf16.msra.mxu1 %v421_v14  ;;  %v422_v17 = vld [vmem:[%s556_s3 + $0x30] sm:$0xff]   ;;  %v416_v18 = vld [vmem:[%s554_s1 + $0x8] sm:$0xff]   ;;  %v417_v19 = vld [vmem:[%s554_s1 + $0x40] sm:$0xff]   ;;  %v323_v23 = vcombine.low %v21_v12, %v21_v12 }
   0x7   :  { %353 = vmatpush3.bf16.msra.mxu0 %v406_v4  ;;  %383 = vmatprep.subr.bf16.mxu1 %v429_v1  ;;  %v423_v20 = vld [vmem:[%s556_s3 + $0x28] sm:$0xff]   ;;  %v418_v21 = vld [vmem:[%s554_s1] sm:$0xff]   ;;  %v425_v24 = vld [vmem:[%s556_s3 + $0x18] sm:$0xff]  }
   0x8   :  { %354 = vmatprep.subr.bf16.mxu0 %v407_v5  ;;  %196 = vmatprep.mubr.bf16.mxu0 %v324_v13  ;;  %v424_v22 = vld [vmem:[%s556_s3 + $0x20] sm:$0xff]   ;;  %v426_v25 = vld [vmem:[%s556_s3 + $0x10] sm:$0xff]   ;;  %v427_v26 = vld [vmem:[%s556_s3 + $0x8] sm:$0xff]  }
   0x9   :  { %v428_v27 = vld [vmem:[%s556_s3] sm:$0xff]  }
   0xa   :  { %384 = vmatpush3.bf16.msra.mxu1 %v422_v17  ;;  %v322_v29 = vld [vmem:[%s557_s2] ss:$0 sm:$0xff] }
   0xb   :  { %355 = vmatpush3.bf16.msra.mxu0 %v408_v6  ;;  %385 = vmatprep.subr.bf16.mxu1 %v429_v1  ;;  %v341_v37 = vld [vmem:[%s558_s4] ss:$0 sm:$0xff] }
   0xc   :  { %356 = vmatprep.subr.bf16.mxu0 %v409_v7 }
   0xe   :  { %386 = vmatpush3.bf16.msra.mxu1 %v423_v20 }
   0xf   :  { %357 = vmatpush3.bf16.msra.mxu0 %v410_v8  ;;  %387 = vmatprep.subr.bf16.mxu1 %v429_v1 }
  0x10   :  { %358 = vmatprep.subr.bf16.mxu0 %v411_v9 }
  0x12   :  { %388 = vmatpush3.bf16.msra.mxu1 %v424_v22 }
  0x13   :  { %359 = vmatpush3.bf16.msra.mxu0 %v412_v10  ;;  %389 = vmatprep.subr.bf16.mxu1 %v429_v1 }
  0x14   :  { %360 = vmatprep.subr.bf16.mxu0 %v413_v11 }
  0x16   :  { %390 = vmatpush3.bf16.msra.mxu1 %v425_v24 }
  0x17   :  { %361 = vmatpush3.bf16.msra.mxu0 %v414_v15  ;;  %391 = vmatprep.subr.bf16.mxu1 %v429_v1 }
  0x18   :  { %362 = vmatprep.subr.bf16.mxu0 %v415_v16 }
  0x1a   :  { %392 = vmatpush3.bf16.msra.mxu1 %v426_v25 }
  0x1b   :  { %363 = vmatpush3.bf16.msra.mxu0 %v416_v18  ;;  %393 = vmatprep.subr.bf16.mxu1 %v429_v1 }
  0x1c   :  { %364 = vmatprep.subr.bf16.mxu0 %v417_v19 }
  0x1e   :  { %394 = vmatpush3.bf16.msra.mxu1 %v427_v26 }
  0x1f   :  { %365 = vmatpush3.bf16.msra.mxu0 %v418_v21  ;;  %395 = vmatprep.subr.bf16.mxu1 %v429_v1 }
  0x22   :  { %197 = vmatmul.mubr.bf16.vlgmr.msra.gmra.mxu0 %v323_v23  ;;  %396 = vmatpush3.bf16.msra.mxu1 %v428_v27 }
  0xe2   :  { %v366_v28 = vpop.f32.mrf.mxu0 }
  0xe4   :  { %v367_v30 = vpop.f32.mrf.mxu0 }
  0xe5   :  { %v368_v31 = vadd.f32 %v367_v30, %v366_v28 }
  0xe6   :  { %v369_v32 = vpop.f32.mrf.mxu0 }
  0xe7   :  { %v199_v33 = vadd.f32 %v368_v31, %v322_v29 }
  0xe8   :  { %v370_v34 = vpop.f32.mrf.mxu0 }
  0xe9   :  { %v204_v35 = vmax.f32 %v199_v33, 0.0 }
  0xeb   :  { %v205_v36 = vpack.c.bf16 %v204_v35, %v204_v35 }
  0xed   :  { %398 = vmatmul.mubr.bf16.vlgmr.msra.gmra.mxu1 %v205_v36 }
 0x1ad   :  { %v311_v38 = vpop.f32.mrf.mxu1 }
 0x1ae   :  { %v312_v39 = vadd.f32 %v341_v37, %v311_v38 }
 0x1af   :  { %v399_v40 = vpop.f32.mrf.mxu1 }
 0x1b0   :  { %317 = vst [vmem:[%s559_s5] sm:$0xff] %v312_v39 }
 0x1b1   :  { %v314_v41 = vpop.f32.mrf.mxu1 }
 0x1b3   :  { %v400_v42 = vpop.f32.mrf.mxu1 }

</bundles_post_ra>
